<compile_context>
chip_gen: v7x
topology: tpu7x:2x2x1
jax: 0.10.0
libtpu: 0.0.40
codegen_flags: <defaults>
</compile_context>

<pallas_src>
import jax
import jax.numpy as jnp
from jax.experimental import pallas as pl
from jax.experimental.pallas import tpu as pltpu


def mlp_kernel(x_ref, p_ref, oT_ref):
    # x_ref : (TILE_B, 20)  natural layout block of the (padded) batch
    # p_ref : (28, 21)      packed params: rows 0:16 W1|b1, 16:24 W2|b2, 24:28 W3|b3
    # oT_ref: (4, TILE_B)   transposed output (batch on lanes -> lane-dense store)
    x = x_ref[...]
    p = p_ref[...]

    w1 = p[0:16, 0:20]      # (16, 20)
    b1 = p[0:16, 20:21]     # (16, 1)
    w2 = p[16:24, 0:16]     # (8, 16)
    b2 = p[16:24, 20:21]    # (8, 1)
    w3 = p[24:28, 0:8]      # (4, 8)
    b3 = p[24:28, 20:21]    # (4, 1)

    # h1T = W1 @ x^T : contract feature dims, batch stays on the lane axis.
    nt = (((1,), (1,)), ((), ()))  # lhs dim 1 with rhs dim 1 (i.e. rhs transposed)
    h1 = jax.lax.dot_general(w1, x, nt, preferred_element_type=jnp.float32) + b1
    h1 = jnp.maximum(h1, 0.0)                                          # (16, TILE_B)

    h2 = jnp.dot(w2, h1, preferred_element_type=jnp.float32) + b2
    h2 = jnp.maximum(h2, 0.0)                                          # (8, TILE_B)

    logits = jnp.dot(w3, h2, preferred_element_type=jnp.float32) + b3  # (4, TILE_B)

    # Softmax over the feature axis (sublane axis 0 == torch dim=1), exact divide.
    m = jnp.max(logits, axis=0, keepdims=True)
    e = jnp.exp(logits - m)
    denom = jnp.sum(e, axis=0, keepdims=True)
    oT_ref[...] = (e / denom).astype(oT_ref.dtype)


def _round_up(n, m):
    return ((n + m - 1) // m) * m


def _pick_tile(batch):
    # >=2 tiles when the batch allows (keeps both v7x TCs busy); multiple of the
    # 128-lane width; capped at 512 so live activations stay within the vregs.
    return max(128, min(512, _round_up(pl.cdiv(batch, 2), 128)))


def _mlp_forward(x, params):
    w1, b1, w2, b2, w3, b3 = params        # w: (out, in), b: (out,)
    B, in_dim = x.shape                    # in_dim == 20
    out_dim = w3.shape[0]                  # 4

    tile_b = _pick_tile(B)
    n_tiles = pl.cdiv(B, tile_b)
    Bp = n_tiles * tile_b

    # Pad the batch to a tile multiple (single fused pad under jit). Padded rows
    # are zeros and are sliced off after the call.
    xp = jnp.pad(x, ((0, Bp - B), (0, 0)))

    # Coalesce all weights/biases into one resident VMEM slab (biases in col 20).
    slab = jnp.zeros((28, in_dim + 1), jnp.float32)
    slab = slab.at[0:16, 0:20].set(w1)
    slab = slab.at[0:16, 20].set(b1)
    slab = slab.at[16:24, 0:16].set(w2)
    slab = slab.at[16:24, 20].set(b2)
    slab = slab.at[24:28, 0:8].set(w3)
    slab = slab.at[24:28, 20].set(b3)

    outT = pl.pallas_call(
        mlp_kernel,
        out_shape=jax.ShapeDtypeStruct((out_dim, Bp), jnp.float32),
        grid=(n_tiles,),
        in_specs=[
            pl.BlockSpec((tile_b, in_dim), lambda i: (i, 0)),   # batch-tiled input
            pl.BlockSpec(slab.shape, lambda i: (0, 0)),         # resident param slab
        ],
        out_specs=pl.BlockSpec((out_dim, tile_b), lambda i: (0, i)),
        compiler_params=pltpu.CompilerParams(
            dimension_semantics=("parallel",),        # shard batch tiles across TCs
            vmem_limit_bytes=32 * 1024 * 1024,        # explicit budget, v7x-safe
        ),
    )(xp, slab)

    return outT[:, :B].T


mlp_forward = jax.jit(_mlp_forward)


def init_params(key):
    # Deterministic init mimicking nn.Linear's uniform(-1/sqrt(fan_in), 1/sqrt(fan_in)).
    dims = [(20, 16), (16, 8), (8, 4)]
    params = []
    for i, (fan_in, fan_out) in enumerate(dims):
        kw, kb = jax.random.split(jax.random.fold_in(key, i))
        bound = 1.0 / jnp.sqrt(fan_in)
        w = jax.random.uniform(kw, (fan_out, fan_in), jnp.float32, -bound, bound)
        b = jax.random.uniform(kb, (fan_out,), jnp.float32, -bound, bound)
        params += [w, b]
    return tuple(params)


if __name__ == "__main__":
    key = jax.random.PRNGKey(0)
    params = init_params(key)

    # Batch not a multiple of the tile on purpose, to exercise padding + slicing.
    B = 500
    x = jax.random.normal(jax.random.fold_in(key, 100), (B, 20), jnp.float32)

    out = jax.block_until_ready(mlp_forward(x, params))

    # Reference check in plain JAX (weights are (out, in), biases (out,)).
    w1, b1, w2, b2, w3, b3 = params
    h1 = jnp.maximum(x @ w1.T + b1, 0.0)
    h2 = jnp.maximum(h1 @ w2.T + b2, 0.0)
    ref = jax.nn.softmax(h2 @ w3.T + b3, axis=1)

    assert out.shape == (B, 4)
    assert jnp.allclose(out, ref, atol=1e-4, rtol=1e-4)
    assert jnp.allclose(jnp.sum(out, axis=1), 1.0, atol=1e-5)

    print("KERNEL_OK")
</pallas_src>

<mosaic_0001>
module attributes {stable_mosaic.version = 11 : i64} {
  func.func @mlp_kernel(%arg0: i32, %arg1: memref<256x20xf32, #tpu.memory_space<vmem>>, %arg2: memref<28x21xf32, #tpu.memory_space<vmem>>, %arg3: memref<4x256xf32, #tpu.memory_space<vmem>>) attributes {dimension_semantics = [#tpu.dimension_semantics<parallel>], iteration_bounds = array<i64: 2>, scalar_prefetch = 0 : i64, scratch_operands = 0 : i64, tpu.core_type = #tpu.core_type<tc>, window_params = [{transform_indices = @transform_0, window_bounds = array<i64: 256, 20>}, {pipeline_mode = #tpu.pipeline_mode<synchronous>, transform_indices = @transform_1, window_bounds = array<i64: 28, 21>}, {transform_indices = @transform_2, window_bounds = array<i64: 4, 256>}]} {
    %c0 = arith.constant 0 : index
    %c0_0 = arith.constant 0 : index
    %0 = vector.load %arg1[%c0, %c0_0] : memref<256x20xf32, #tpu.memory_space<vmem>>, vector<256x20xf32>
    %c0_1 = arith.constant 0 : index
    %c0_2 = arith.constant 0 : index
    %1 = vector.load %arg2[%c0_1, %c0_2] : memref<28x21xf32, #tpu.memory_space<vmem>>, vector<28x21xf32>
    %2 = vector.extract_strided_slice %1 {offsets = [0, 0], sizes = [16, 20], strides = [1, 1]} : vector<28x21xf32> to vector<16x20xf32>
    %3 = vector.extract_strided_slice %1 {offsets = [0, 20], sizes = [16, 1], strides = [1, 1]} : vector<28x21xf32> to vector<16x1xf32>
    %4 = vector.extract_strided_slice %1 {offsets = [16, 0], sizes = [8, 16], strides = [1, 1]} : vector<28x21xf32> to vector<8x16xf32>
    %5 = vector.extract_strided_slice %1 {offsets = [16, 20], sizes = [8, 1], strides = [1, 1]} : vector<28x21xf32> to vector<8x1xf32>
    %6 = vector.extract_strided_slice %1 {offsets = [24, 0], sizes = [4, 8], strides = [1, 1]} : vector<28x21xf32> to vector<4x8xf32>
    %7 = vector.extract_strided_slice %1 {offsets = [24, 20], sizes = [4, 1], strides = [1, 1]} : vector<28x21xf32> to vector<4x1xf32>
    %cst = arith.constant dense<0.000000e+00> : vector<16x256xf32>
    %8 = tpu.matmul %2, %0, %cst {dimension_numbers = #tpu.dot_dimension_numbers<[1], [1], [0], [0], [0, 0, 1, 0], [], []>} : vector<16x20xf32>, vector<256x20xf32>, vector<16x256xf32> -> vector<16x256xf32>
    %9 = vector.broadcast %3 : vector<16x1xf32> to vector<16x256xf32>
    %10 = arith.addf %8, %9 : vector<16x256xf32>
    %cst_3 = arith.constant 0.000000e+00 : f32
    %11 = vector.broadcast %cst_3 : f32 to vector<16x256xf32>
    %12 = arith.maximumf %10, %11 : vector<16x256xf32>
    %cst_4 = arith.constant dense<0.000000e+00> : vector<8x256xf32>
    %13 = tpu.matmul %4, %12, %cst_4 {dimension_numbers = #tpu.dot_dimension_numbers<[1], [0], [0], [1], [0, 0, 1, 1], [], []>} : vector<8x16xf32>, vector<16x256xf32>, vector<8x256xf32> -> vector<8x256xf32>
    %14 = vector.broadcast %5 : vector<8x1xf32> to vector<8x256xf32>
    %15 = arith.addf %13, %14 : vector<8x256xf32>
    %cst_5 = arith.constant 0.000000e+00 : f32
    %16 = vector.broadcast %cst_5 : f32 to vector<8x256xf32>
    %17 = arith.maximumf %15, %16 : vector<8x256xf32>
    %cst_6 = arith.constant dense<0.000000e+00> : vector<4x256xf32>
    %18 = tpu.matmul %6, %17, %cst_6 {dimension_numbers = #tpu.dot_dimension_numbers<[1], [0], [0], [1], [0, 0, 1, 1], [], []>} : vector<4x8xf32>, vector<8x256xf32>, vector<4x256xf32> -> vector<4x256xf32>
    %19 = vector.broadcast %7 : vector<4x1xf32> to vector<4x256xf32>
    %20 = arith.addf %18, %19 : vector<4x256xf32>
    %cst_7 = arith.constant dense<0xFF800000> : vector<256xf32>
    %21 = vector.multi_reduction <maximumf>, %20, %cst_7 [0] : vector<4x256xf32> to vector<256xf32>
    %22 = vector.shape_cast %21 : vector<256xf32> to vector<1x256xf32>
    %23 = vector.broadcast %22 : vector<1x256xf32> to vector<4x256xf32>
    %24 = arith.subf %20, %23 : vector<4x256xf32>
    %25 = math.exp %24 : vector<4x256xf32>
    %cst_8 = arith.constant dense<0.000000e+00> : vector<256xf32>
    %26 = vector.multi_reduction <add>, %25, %cst_8 [0] : vector<4x256xf32> to vector<256xf32>
    %27 = vector.shape_cast %26 : vector<256xf32> to vector<1x256xf32>
    %28 = vector.broadcast %27 : vector<1x256xf32> to vector<4x256xf32>
    %29 = arith.divf %25, %28 : vector<4x256xf32>
    %c0_9 = arith.constant 0 : index
    %c0_10 = arith.constant 0 : index
    %30 = vector.load %arg3[%c0_9, %c0_10] : memref<4x256xf32, #tpu.memory_space<vmem>>, vector<4x256xf32>
    tpu.vector_store %arg3[%c0_9, %c0_10], %29 {strides = array<i32>} : memref<4x256xf32, #tpu.memory_space<vmem>>, vector<4x256xf32>,
    return
  }
  func.func @transform_0(%arg0: i32) -> (i32, i32) {
    %c0_i32 = arith.constant 0 : i32
    %c0_i32_0 = arith.constant 0 : i32
    return %arg0, %c0_i32 : i32, i32
  }
  func.func @transform_1(%arg0: i32) -> (i32, i32) {
    %c0_i32 = arith.constant 0 : i32
    %c0_i32_0 = arith.constant 0 : i32
    %c0_i32_1 = arith.constant 0 : i32
    return %c0_i32, %c0_i32_0 : i32, i32
  }
  func.func @transform_2(%arg0: i32) -> (i32, i32) {
    %c0_i32 = arith.constant 0 : i32
    %c0_i32_0 = arith.constant 0 : i32
    return %c0_i32, %arg0 : i32, i32
  }
}

</mosaic_0001>

<bundles_post_ra>
// kernel: _mlp_forward.1
= control target key start
LH: loop header
LB: loop body
LE: loop exit
PB: predicated region body
PF: predicated region fallthrough
CT: control target
= control target key end

     0   :  { %s815_s9 = smov 0   ;;  %s938_s0 = inlined_call_operand.vmem [shape: f32[512,20], index: 0, kind: input, shape index: {}]   ;;  %s939_s1 = inlined_call_operand.vmem [shape: f32[28,21], index: 1, kind: input, shape index: {}]   ;;  %s940_s2 = inlined_call_operand.vmem [shape: f32[4,512], index: 2, kind: output, shape index: {}]  }
   0x1 LB: > { %s635_s10 = sadd.s32 4294967295, %s796_s9   ;;  %p639_p0 = scmp.ge.s32.totalorder %s796_s9, 1  ;;  %s796_s9 = sphi %s815_s9, %s12_s9  }
   0x2   : > { %p113_p1 = scmp.lt.s32.totalorder %s796_s9, 3 }
   0x4   : > { %p114_p2 = pnand %p639_p0, %p113_p1 }
   0x5   : > { %s640_s11 = sshll.u32 (!%p114_p2), %s635_s10, 5  ;;  %vm193_vm0 = vcmask (!%p114_p2), 162816   ;;  %v828_v0 = vld [vmem:[%s939_s1] sm:$0xff] (!%p114_p2)  ;;  %v798_v1 = vmov (!%p114_p2), 20   ;;  %v836_v2 = vld [vmem:[%s939_s1 + $0x8] sm:$0xff] (!%p114_p2)  ;;  %v181_v52 = vld [vmem:[%s939_s1 + $0x10] sm:$0xff] (!%p114_p2) }
   0x6   : > { %117 = sbr.rel (%p114_p2) target bundleno = 801 (0x321), region = 28  ;;  %p136_p3 = scmp.lt.s32.totalorder (!%p114_p2), %s640_s11, 63  ;;  %714 = vmatprep.mubr.msk.f32.mxu0 (!%p114_p2), %vm193_vm0, %v828_v0  ;;  %780 = vset.pattern.permute.xlu0 (!%p114_p2), %v798_v1  ;;  %vm845_vm1 = vmpackc.low (!%p114_p2), %vm193_vm0, %vm193_vm0  ;;  %v799_v53 = vmov (!%p114_p2), 0.0   ;;  %v182_v54 = vld [vmem:[%s939_s1 + $0x18] sm:$0xf] (!%p114_p2)  ;;  %vm380_vm2 = vcmask (!%p114_p2), 130048  }
   0x7   : > { %185 = vperm.xlu0 (!%p114_p2), %780, %v828_v0   ;;  %781 = vset.pattern.permute.xlu1 (!%p114_p2), %v798_v1  ;;  %vm461_vm3 = vcmask (!%p114_p2), 64512   ;;  %vm535_vm4 = vcmask (!%p114_p2), 1043456   ;;  %s642_s24 = sshll.u32 (!%p114_p2), %s635_s10, 1 }
   0x8   : > { %447 = vmatprep.mubr.f32.mxu1 (!%p114_p2), %v799_v53  ;;  %377 = vperm.xlu1 (!%p114_p2), %781, %v181_v52   ;;  %p142_p4 = scmp.lt.s32.totalorder (!%p114_p2), %s642_s24, 3 }
   0xb   : > { %190 = vperm.xlu0 (!%p114_p2), %780, %v836_v2  }
   0xc   : > { %458 = vperm.xlu1 (!%p114_p2), %781, %v182_v54  }
   0xd   : > { %s944_s11 = smov (!%p136_p3, %s640_s11), 63  ;;  %s946_s24 = smov (!%p142_p4, %s642_s24), 3 }
   0xe   : > { %s641_s14 = sshll.u32 %s944_s11, 3  ;;  %s643_s25 = sshll.u32 %s946_s24, 2 }
   0xf   : > { %s841_s19 = scalar_lea.vmem %s938_s0, %s641_s14  ;;  %s145_s28 = scalar_lea.vmem %s940_s2, %s643_s25 }
  0x10   : > { %v163_v4 = vld [vmem:[%s841_s19 + $0x80] sm:$0xff]  ;;  %v164_v5 = vld [vmem:[%s841_s19 + $0x88] sm:$0xff]  ;;  %v165_v9 = vld [vmem:[%s841_s19 + $0x90] sm:$0xff] }
  0x11   : > { %v147_v6 = vld [vmem:[%s841_s19] sm:$0xff]  ;;  %v718_v7 = vpack.c.bf16 %v164_v5, %v163_v4  ;;  %v148_v8 = vld [vmem:[%s841_s19 + $0x8] sm:$0xff]  ;;  %v166_v10 = vld [vmem:[%s841_s19 + $0x98] sm:$0xff] }
  0x12   : > { %v721_v11 = vpack.c.bf16 %v148_v8, %v147_v6  ;;  %v724_v12 = vpack.c.bf16 %v166_v10, %v165_v9  ;;  %v149_v13 = vld [vmem:[%s841_s19 + $0x10] sm:$0xff]  ;;  %v150_v14 = vld [vmem:[%s841_s19 + $0x18] sm:$0xff]  ;;  %v167_v15 = vld [vmem:[%s841_s19 + $0xa0] sm:$0xff] }
  0x13   : > { %720 = vmatprep.subr.msk.bf16.mxu0 %vm845_vm1, %v718_v7  ;;  %v168_v16 = vld [vmem:[%s841_s19 + $0xa8] sm:$0xff]  ;;  %v727_v17 = vpack.c.bf16 %v150_v14, %v149_v13  ;;  %v151_v19 = vld [vmem:[%s841_s19 + $0x20] sm:$0xff]  ;;  %v169_v21 = vld [vmem:[%s841_s19 + $0xb0] sm:$0xff] }
  0x14   : > { %723 = vmatpush3.bf16.xpose.msk.msra.mxu0 %vm845_vm1, %v721_v11  ;;  %v730_v18 = vpack.c.bf16 %v168_v16, %v167_v15  ;;  %v152_v20 = vld [vmem:[%s841_s19 + $0x28] sm:$0xff]  ;;  %v170_v22 = vld [vmem:[%s841_s19 + $0xb8] sm:$0xff]  ;;  %v153_v25 = vld [vmem:[%s841_s19 + $0x30] sm:$0xff] }
  0x15   : > { %726 = vmatprep.subr.msk.bf16.mxu0 %vm845_vm1, %v724_v12  ;;  %v733_v23 = vpack.c.bf16 %v152_v20, %v151_v19  ;;  %v736_v24 = vpack.c.bf16 %v170_v22, %v169_v21  ;;  %v154_v26 = vld [vmem:[%s841_s19 + $0x38] sm:$0xff]  ;;  %v171_v27 = vld [vmem:[%s841_s19 + $0xc0] sm:$0xff]  ;;  %v172_v28 = vld [vmem:[%s841_s19 + $0xc8] sm:$0xff] }
  0x16   : > { %v739_v29 = vpack.c.bf16 %v154_v26, %v153_v25  ;;  %v742_v30 = vpack.c.bf16 %v172_v28, %v171_v27  ;;  %v155_v31 = vld [vmem:[%s841_s19 + $0x40] sm:$0xff]  ;;  %v156_v32 = vld [vmem:[%s841_s19 + $0x48] sm:$0xff]  ;;  %v173_v33 = vld [vmem:[%s841_s19 + $0xd0] sm:$0xff] }
  0x17   : > { %v174_v34 = vld [vmem:[%s841_s19 + $0xd8] sm:$0xff]  ;;  %v745_v35 = vpack.c.bf16 %v156_v32, %v155_v31  ;;  %v157_v37 = vld [vmem:[%s841_s19 + $0x50] sm:$0xff]  ;;  %v175_v39 = vld [vmem:[%s841_s19 + $0xe0] sm:$0xff] }
  0x18   : > { %v748_v36 = vpack.c.bf16 %v174_v34, %v173_v33  ;;  %v158_v38 = vld [vmem:[%s841_s19 + $0x58] sm:$0xff]  ;;  %v176_v40 = vld [vmem:[%s841_s19 + $0xe8] sm:$0xff]  ;;  %v159_v43 = vld [vmem:[%s841_s19 + $0x60] sm:$0xff] }
  0x19   : > { %v751_v41 = vpack.c.bf16 %v158_v38, %v157_v37  ;;  %v754_v42 = vpack.c.bf16 %v176_v40, %v175_v39  ;;  %v160_v44 = vld [vmem:[%s841_s19 + $0x68] sm:$0xff]  ;;  %v177_v45 = vld [vmem:[%s841_s19 + $0xf0] sm:$0xff]  ;;  %v178_v46 = vld [vmem:[%s841_s19 + $0xf8] sm:$0xff] }
  0x1a   : > { %v757_v47 = vpack.c.bf16 %v160_v44, %v159_v43  ;;  %v760_v48 = vpack.c.bf16 %v178_v46, %v177_v45  ;;  %v161_v49 = vld [vmem:[%s841_s19 + $0x70] sm:$0xff]  ;;  %v162_v50 = vld [vmem:[%s841_s19 + $0x78] sm:$0xff] }
  0x1b   : > { %v763_v51 = vpack.c.bf16 %v162_v50, %v161_v49 }
  0x1c   : > { %729 = vmatpush3.bf16.xpose.msk.msra.mxu0 %vm845_vm1, %v727_v17 }
  0x1d   : > { %732 = vmatprep.subr.msk.bf16.mxu0 %vm845_vm1, %v730_v18 }
  0x24   : > { %735 = vmatpush3.bf16.xpose.msk.msra.mxu0 %vm845_vm1, %v733_v23 }
  0x25   : > { %738 = vmatprep.subr.msk.bf16.mxu0 %vm845_vm1, %v736_v24 }
  0x2c   : > { %741 = vmatpush3.bf16.xpose.msk.msra.mxu0 %vm845_vm1, %v739_v29 }
  0x2d   : > { %744 = vmatprep.subr.msk.bf16.mxu0 %vm845_vm1, %v742_v30 }
  0x34   : > { %747 = vmatpush3.bf16.xpose.msk.msra.mxu0 %vm845_vm1, %v745_v35 }
  0x35   : > { %750 = vmatprep.subr.msk.bf16.mxu0 %vm845_vm1, %v748_v36 }
  0x3c   : > { %753 = vmatpush3.bf16.xpose.msk.msra.mxu0 %vm845_vm1, %v751_v41 }
  0x3d   : > { %756 = vmatprep.subr.msk.bf16.mxu0 %vm845_vm1, %v754_v42 }
  0x44   : > { %759 = vmatpush3.bf16.xpose.msk.msra.mxu0 %vm845_vm1, %v757_v47 }
  0x45   : > { %762 = vmatprep.subr.msk.bf16.mxu0 %vm845_vm1, %v760_v48 }
  0x4c   : > { %765 = vmatpush3.bf16.xpose.msk.msra.mxu0 %vm845_vm1, %v763_v51 }
  0x53   : > { %715 = vmatmul.mubr.msk.f32.vlgmr.msra.gmra.mrb[0].mxu0 %vm193_vm0, %v828_v0 }
  0x54   : > { %716 = vmatprep.mubr.msk.f32.mxu0 %vm193_vm0, %v836_v2 }
  0x57   : > { %717 = vmatmul.mubr.msk.f32.gmra.mrb[2].mxu0 %vm193_vm0, %v836_v2 }
  0x86   : > { %v186_v55 = vpop.permute.xlu0 %185 }
  0x87   : > { %v378_v7 = vpop.permute.xlu1 %377 }
  0x8a   : > { %v191_v59 = vpop.permute.xlu0 %190 }
  0x8b   : > { %v459_v14 = vpop.permute.xlu1 %458 }
 0x126   : > { %v360_v56 = vpop.f32.mrb[0].mxu0 }
 0x127   : > { %v362_v57 = vpop.f32.mrb[1].mxu0  ;;  %v361_v58 = vadd.f32 %v360_v56, %v186_v55 }
 0x128   : > { %v363_v60 = vadd.f32 %v362_v57, %v186_v55 }
 0x129   : > { %v371_v1 = vmax.f32 %v361_v58, 0.0 }
 0x12a   : > { %v366_v61 = vpop.f32.mrb[2].mxu0  ;;  %v372_v3 = vmax.f32 %v363_v60, 0.0 }
 0x12b   : > { %v367_v62 = vadd.f32 %v366_v61, %v191_v59  ;;  %v368_v63 = vpop.f32.mrb[3].mxu0 }
 0x12c   : > { %v369_v0 = vadd.f32 %v368_v63, %v191_v59 }
 0x12d   : > { %v373_v2 = vmax.f32 %v367_v62, 0.0 }
 0x12e   : > { %v374_v4 = vmax.f32 %v369_v0, 0.0 }
 0x12f   : > { %v768_v5 = vpack.c.bf16 %v373_v2, %v371_v1 }
 0x130   : > { %v766_v6 = vpack.c.bf16 %v374_v4, %v372_v3 }
 0x132   : > { %767 = vmatprep.subr.bf16.mxu1 %v766_v6 }
 0x133   : > { %769 = vmatpush1.bf16.msra.mxu1 %v768_v5 }
 0x136   : > { %678 = vmatmul.mubr.msk.f32.vlgmr.msra.gmra.mrb[0].mxu1 %vm380_vm2, %v181_v52 }
 0x137   : > { %528 = vmatprep.mubr.f32.mxu1 %v799_v53 }
 0x209   : > { %v449_v8 = vpop.f32.mrb[0].mxu1 }
 0x20a   : > { %v450_v9 = vadd.f32 %v449_v8, %v378_v7  ;;  %v451_v10 = vpop.f32.mrb[1].mxu1 }
 0x20b   : > { %v452_v11 = vadd.f32 %v451_v10, %v378_v7 }
 0x20c   : > { %v454_v13 = vmax.f32 %v450_v9, 0.0 }
 0x20d   : > { %v455_v12 = vmax.f32 %v452_v11, 0.0 }
 0x20f   : > { %464 = vmatprep.subr.mxu1 %v455_v12 }
 0x210   : > { %465 = vmatpush1.msra.mxu1 %v454_v13 }
 0x211   : > { %679 = vmatmul.mubr.msk.f32.vlgmr.msra.gmra.mrb[2].mxu1 %vm461_vm3, %v182_v54 }
 0x2e4   : > { %v530_v15 = vpop.f32.mrb[2].mxu1 }
 0x2e5   : > { %v531_v16 = vadd.f32 %v530_v15, %v459_v14  ;;  %v532_v17 = vpop.f32.mrb[3].mxu1 }
 0x2e6   : > { %v533_v18 = vadd.f32 %v532_v17, %v459_v14 }
 0x2e7   : > { %v536_v19 = vsel %vm535_vm4, %v531_v16, -inf }
 0x2e8   : > { %v537_v20 = vrot.slane %v536_v19, 4  ;;  %v543_v21 = vsel %vm535_vm4, %v533_v18, -inf }
 0x2e9   : > { %v544_v22 = vrot.slane %v543_v21, 4 }
 0x2ea   : > { %v538_v23 = vmax.f32 %v536_v19, %v537_v20 }
 0x2eb   : > { %v545_v24 = vmax.f32 %v543_v21, %v544_v22 }
 0x2ec   : > { %v539_v25 = vrot.slane %v538_v23, 2 }
 0x2ed   : > { %v546_v26 = vrot.slane %v545_v24, 2 }
 0x2ee   : > { %v540_v27 = vmax.f32 %v538_v23, %v539_v25 }
 0x2ef   : > { %v547_v28 = vmax.f32 %v545_v24, %v546_v26 }
 0x2f0   : > { %v541_v29 = vrot.slane %v540_v27, 1 }
 0x2f1   : > { %v548_v30 = vrot.slane %v547_v28, 1 }
 0x2f2   : > { %v542_v31 = vmax.f32 %v540_v27, %v541_v29 }
 0x2f3   : > { %v549_v32 = vmax.f32 %v547_v28, %v548_v30 }
 0x2f4   : > { %v550_v33 = vsub.f32 %v531_v16, %v542_v31 }
 0x2f5   : > { %v551_v34 = vsub.f32 %v533_v18, %v549_v32 }
 0x2f6   : > { %v552_v35 = vmul.f32 1.442695, %v550_v33 }
 0x2f7   : > { %v554_v36 = vmul.f32 1.442695, %v551_v34 }
 0x2f8   : > { %782 = vpow2.f32 %v552_v35 }
 0x2f9   : > { %784 = vpow2.f32 %v554_v36 }
 0x302   : > { %v783_v37 = vpop.eup %782 }
 0x303   : > { %v785_v38 = vpop.eup %784  ;;  %v556_v39 = vsel %vm535_vm4, %v783_v37, 0.0 }
 0x304   : > { %v557_v40 = vrot.slane %v556_v39, 4  ;;  %v563_v41 = vsel %vm535_vm4, %v785_v38, 0.0 }
 0x305   : > { %v564_v42 = vrot.slane %v563_v41, 4 }
 0x306   : > { %v558_v43 = vadd.f32 %v557_v40, %v556_v39 }
 0x307   : > { %v565_v44 = vadd.f32 %v564_v42, %v563_v41 }
 0x308   : > { %v559_v45 = vrot.slane %v558_v43, 2 }
 0x309   : > { %v566_v46 = vrot.slane %v565_v44, 2 }
 0x30a   : > { %v560_v47 = vadd.f32 %v559_v45, %v558_v43 }
 0x30b   : > { %v567_v48 = vadd.f32 %v566_v46, %v565_v44 }
 0x30c   : > { %v561_v49 = vrot.slane %v560_v47, 1 }
 0x30d   : > { %v568_v50 = vrot.slane %v567_v48, 1 }
 0x30e   : > { %v562_v51 = vadd.f32 %v561_v49, %v560_v47 }
 0x30f   : > { %v569_v52 = vadd.f32 %v568_v50, %v567_v48 }
 0x310   : > { %786 = vrcp.f32 %v562_v51 }
 0x311   : > { %788 = vrcp.f32 %v569_v52 }
 0x31a   : > { %v787_v53 = vpop.eup %786 }
 0x31b   : > { %v789_v54 = vpop.eup %788  ;;  %v571_v55 = vmul.f32 %v787_v53, %v783_v37 }
 0x31c   : > { %v573_v56 = vmul.f32 %v789_v54, %v785_v38 }
 0x31e   : > { %v576_v57 = vcombine.low %v571_v55, %v573_v56 }
 0x320   : > { %578 = vst [vmem:[%s145_s28] sm:$0xff] %v576_v57 }
 0x321 PF: > { %s12_s9 = sadd.s32 1, %s796_s9  }
 0x322   : > { %p9_p5 = scmp.ge.s32.totalorder %s12_s9, 4  }
 0x324   :  { %11 = sbr.rel (!%p9_p5) target bundleno = 1 (0x1), region = 58 }

</bundles_post_ra>
